<compile_context>
chip_gen: v6e
topology: v6e:2x2x1
jax: 0.10.0
libtpu: 0.0.40
codegen_flags: <defaults>
</compile_context>

<pallas_src>
import math

import jax
import jax.numpy as jnp
from jax.experimental import pallas as pl
from jax.experimental.pallas import tpu as pltpu


def _round_up(x, m):
    return ((x + m - 1) // m) * m


_BUDGET = None


def _vmem_budget():
    """(vmem_limit_bytes, tile_cap) — generation aware (v7x: 64 MiB VMEM -> 256 tiles)."""
    global _BUDGET
    if _BUDGET is None:
        cap = 64 * 1024 * 1024
        try:
            cap = int(getattr(pltpu.get_tpu_info(), "vmem_capacity_bytes", cap))
        except Exception:
            pass
        limit = min(int(cap * 3 // 4), 96 * 1024 * 1024)
        tile_cap = 256 if cap <= 64 * 1024 * 1024 else 512
        _BUDGET = (limit, tile_cap)
    return _BUDGET


# ----------------------------------------------------------------------------
# Kernels
# ----------------------------------------------------------------------------
def _gin_mlp_kernel(adj_ref, xk_ref, w1_ref, b1_ref, w2_ref, b2_ref, pe_ref, acc_ref):
    """acc = adj_tile @ x_tile (self-term folded into adj diag); last j: fused MLP."""
    j = pl.program_id(2)
    part = jnp.dot(adj_ref[...], xk_ref[...], preferred_element_type=jnp.float32)

    @pl.when(j == 0)
    def _():
        acc_ref[...] = part

    @pl.when(j != 0)
    def _():
        acc_ref[...] += part

    @pl.when(j == pl.num_programs(2) - 1)
    def _():
        z = acc_ref[...].astype(jnp.bfloat16)
        h = jnp.dot(z, w1_ref[...], preferred_element_type=jnp.float32) + b1_ref[...]
        h = jnp.maximum(h, 0.0).astype(jnp.bfloat16)
        o = jnp.dot(h, w2_ref[...], preferred_element_type=jnp.float32) + b2_ref[...]
        pe_ref[...] = o.astype(pe_ref.dtype)


def _gin_mlp_pool_kernel(adj_ref, xk_ref, w1_ref, b1_ref, w2_ref, b2_ref,
                         pmat_ref, carry_ref, pe_ref, pool_ref, acc_ref):
    """Last GIN layer: aggregation + MLP + fused running_sum += PE.sum(dim=1)."""
    j = pl.program_id(2)
    part = jnp.dot(adj_ref[...], xk_ref[...], preferred_element_type=jnp.float32)

    @pl.when(j == 0)
    def _():
        acc_ref[...] = part

    @pl.when(j != 0)
    def _():
        acc_ref[...] += part

    @pl.when(j == pl.num_programs(2) - 1)
    def _():
        z = acc_ref[...].astype(jnp.bfloat16)
        h = jnp.dot(z, w1_ref[...], preferred_element_type=jnp.float32) + b1_ref[...]
        h = jnp.maximum(h, 0.0).astype(jnp.bfloat16)
        o = jnp.dot(h, w2_ref[...], preferred_element_type=jnp.float32) + b2_ref[...]
        pe_ref[...] = o.astype(pe_ref.dtype)
        # pooling over the K blocks as a 0/1 matmul (exact, fp32), carry-accumulated.
        pool_ref[...] = carry_ref[...] + jnp.dot(o, pmat_ref[...],
                                                 preferred_element_type=jnp.float32)


def _agg_kernel(adj_ref, xk_ref, out_ref, acc_ref):
    """Aggregation only (de-kroned path): out = adj @ x, emitted bf16."""
    j = pl.program_id(2)
    part = jnp.dot(adj_ref[...], xk_ref[...], preferred_element_type=jnp.float32)

    @pl.when(j == 0)
    def _():
        acc_ref[...] = part

    @pl.when(j != 0)
    def _():
        acc_ref[...] += part

    @pl.when(j == pl.num_programs(2) - 1)
    def _():
        out_ref[...] = acc_ref[...].astype(out_ref.dtype)


def _mlp_kernel(x_ref, w1_ref, b1_ref, w2_ref, b2_ref, o_ref):
    """Row-tiled Linear->ReLU->Linear; bf16 MXU operands, fp32 accumulation."""
    z = x_ref[...].astype(jnp.bfloat16)
    h = jnp.dot(z, w1_ref[...], preferred_element_type=jnp.float32) + b1_ref[...]
    h = jnp.maximum(h, 0.0).astype(jnp.bfloat16)
    o = jnp.dot(h, w2_ref[...], preferred_element_type=jnp.float32) + b2_ref[...]
    o_ref[...] = o.astype(o_ref.dtype)


# ----------------------------------------------------------------------------
# pallas_call wrappers
# ----------------------------------------------------------------------------
def _gin_layer_call(adj, x, w1b, b1b, w2b, b2b, *, tm, tj, out_dtype, vmem_limit):
    B, Np, _ = adj.shape
    Pin = x.shape[-1]
    Ph = w1b.shape[1]
    Pout = w2b.shape[1]
    grid = (B, Np // tm, Np // tj)
    return pl.pallas_call(
        _gin_mlp_kernel,
        grid=grid,
        out_shape=jax.ShapeDtypeStruct((B, Np, Pout), out_dtype),
        in_specs=[
            pl.BlockSpec((None, tm, tj), lambda b, i, j: (b, i, j)),   # adj (eps folded)
            pl.BlockSpec((None, tj, Pin), lambda b, i, j: (b, j, 0)),  # x (bf16, contraction)
            pl.BlockSpec((Pin, Ph), lambda b, i, j: (0, 0)),           # kron(I_K, W1) bf16
            pl.BlockSpec((1, Ph), lambda b, i, j: (0, 0)),             # b1 (fp32)
            pl.BlockSpec((Ph, Pout), lambda b, i, j: (0, 0)),          # kron(I_K, W2) bf16
            pl.BlockSpec((1, Pout), lambda b, i, j: (0, 0)),           # b2 (fp32)
        ],
        out_specs=pl.BlockSpec((None, tm, Pout), lambda b, i, j: (b, i, 0)),
        scratch_shapes=[pltpu.VMEM((tm, Pin), jnp.float32)],
        compiler_params=pltpu.CompilerParams(
            dimension_semantics=("parallel", "parallel", "arbitrary"),
            vmem_limit_bytes=vmem_limit),
    )(adj, x, w1b, b1b, w2b, b2b)


def _gin_layer_pool_call(adj, x, w1b, b1b, w2b, b2b, pmat, carry, *,
                         tm, tj, vmem_limit):
    B, Np, _ = adj.shape
    Pin = x.shape[-1]
    Ph = w1b.shape[1]
    Pout = w2b.shape[1]
    Opad = pmat.shape[1]
    grid = (B, Np // tm, Np // tj)
    return pl.pallas_call(
        _gin_mlp_pool_kernel,
        grid=grid,
        out_shape=(jax.ShapeDtypeStruct((B, Np, Pout), jnp.float32),
                   jax.ShapeDtypeStruct((B, Np, Opad), jnp.float32)),
        in_specs=[
            pl.BlockSpec((None, tm, tj), lambda b, i, j: (b, i, j)),
            pl.BlockSpec((None, tj, Pin), lambda b, i, j: (b, j, 0)),
            pl.BlockSpec((Pin, Ph), lambda b, i, j: (0, 0)),
            pl.BlockSpec((1, Ph), lambda b, i, j: (0, 0)),
            pl.BlockSpec((Ph, Pout), lambda b, i, j: (0, 0)),
            pl.BlockSpec((1, Pout), lambda b, i, j: (0, 0)),
            pl.BlockSpec((Pout, Opad), lambda b, i, j: (0, 0)),        # pooling matrix
            pl.BlockSpec((None, tm, Opad), lambda b, i, j: (b, i, 0)), # running_sum carry
        ],
        out_specs=(pl.BlockSpec((None, tm, Pout), lambda b, i, j: (b, i, 0)),
                   pl.BlockSpec((None, tm, Opad), lambda b, i, j: (b, i, 0))),
        scratch_shapes=[pltpu.VMEM((tm, Pin), jnp.float32)],
        input_output_aliases={7: 1},   # carry aliased to pooled output (do not reuse carry)
        compiler_params=pltpu.CompilerParams(
            dimension_semantics=("parallel", "parallel", "arbitrary"),
            vmem_limit_bytes=vmem_limit),
    )(adj, x, w1b, b1b, w2b, b2b, pmat, carry)


def _agg_call(adj, x, *, tm, tj, vmem_limit):
    B, Np, _ = adj.shape
    Pin = x.shape[-1]
    grid = (B, Np // tm, Np // tj)
    return pl.pallas_call(
        _agg_kernel,
        grid=grid,
        out_shape=jax.ShapeDtypeStruct((B, Np, Pin), jnp.bfloat16),
        in_specs=[
            pl.BlockSpec((None, tm, tj), lambda b, i, j: (b, i, j)),
            pl.BlockSpec((None, tj, Pin), lambda b, i, j: (b, j, 0)),
        ],
        out_specs=pl.BlockSpec((None, tm, Pin), lambda b, i, j: (b, i, 0)),
        scratch_shapes=[pltpu.VMEM((tm, Pin), jnp.float32)],
        compiler_params=pltpu.CompilerParams(
            dimension_semantics=("parallel", "parallel", "arbitrary"),
            vmem_limit_bytes=vmem_limit),
    )(adj, x)


def mlp_forward(x, w1, b1, w2, b2, *, out_dtype=jnp.float32):
    """Row-tiled 2-layer MLP with lane dims padded to 128 (pads sliced off)."""
    vmem_limit, tile_cap = _vmem_budget()
    R, D = x.shape
    H = w1.shape[1]
    O = w2.shape[1]
    Dp, Hp, Op = _round_up(D, 128), _round_up(H, 128), _round_up(O, 128)
    if R <= tile_cap:
        Rp = _round_up(R, 8)
        tr = Rp
    else:
        Rp = _round_up(R, tile_cap)
        tr = tile_cap
    xp = jnp.pad(x, ((0, Rp - R), (0, Dp - D)))
    w1p = jnp.pad(w1, ((0, Dp - D), (0, Hp - H))).astype(jnp.bfloat16)
    b1p = jnp.pad(b1, ((0, 0), (0, Hp - H))).astype(jnp.float32)
    w2p = jnp.pad(w2, ((0, Hp - H), (0, Op - O))).astype(jnp.bfloat16)
    b2p = jnp.pad(b2, ((0, 0), (0, Op - O))).astype(jnp.float32)
    out = pl.pallas_call(
        _mlp_kernel,
        grid=(Rp // tr,),
        out_shape=jax.ShapeDtypeStruct((Rp, Op), out_dtype),
        in_specs=[
            pl.BlockSpec((tr, Dp), lambda i: (i, 0)),
            pl.BlockSpec((Dp, Hp), lambda i: (0, 0)),
            pl.BlockSpec((1, Hp), lambda i: (0, 0)),
            pl.BlockSpec((Hp, Op), lambda i: (0, 0)),
            pl.BlockSpec((1, Op), lambda i: (0, 0)),
        ],
        out_specs=pl.BlockSpec((tr, Op), lambda i: (i, 0)),
        compiler_params=pltpu.CompilerParams(
            dimension_semantics=("parallel",),
            vmem_limit_bytes=vmem_limit),
    )(xp, w1p, b1p, w2p, b2p)
    return out[:R, :O]


# ----------------------------------------------------------------------------
# Parameter setup + PEARL_PE1 wrapper (stateful running_sum / total = glue).
# ----------------------------------------------------------------------------
def _linear_init(key, fan_in, fan_out):
    kw, kb = jax.random.split(key)
    bound = 1.0 / math.sqrt(fan_in)
    w = jax.random.uniform(kw, (fan_in, fan_out), jnp.float32, -bound, bound)
    b = jax.random.uniform(kb, (1, fan_out), jnp.float32, -bound, bound)
    return w, b


class PEARL_PE1_Pallas:
    """PEARL_PE1 with phi = GIN stack (GINPhi, bn=False) and rho = 2-layer MLP."""

    def __init__(self, n_phi_layers, in_dims, hidden_dims, phi_out_dims,
                 rho_hidden_dims, rho_out_dims, key, *, mlp_mode="auto"):
        self.running_sum = 0
        self.total = 0
        self._rs_pad = None
        self.phi_out_dims = phi_out_dims
        self._rho_out_dims = rho_out_dims
        self.mlp_mode = mlp_mode            # "auto" | "kron" | "dekron"

        self.phi_params = []
        d_in = in_dims
        for layer in range(n_phi_layers):
            d_out = phi_out_dims if layer == n_phi_layers - 1 else hidden_dims
            key, k1, k2 = jax.random.split(key, 3)
            w1, b1 = _linear_init(k1, d_in, hidden_dims)
            w2, b2 = _linear_init(k2, hidden_dims, d_out)
            eps = jnp.zeros((1,), jnp.float32)        # GINConv eps init = 0
            self.phi_params.append((eps, w1, b1, w2, b2))
            d_in = d_out

        key, k1, k2 = jax.random.split(key, 3)
        self.rho_w1, self.rho_b1 = _linear_init(k1, phi_out_dims, rho_hidden_dims)
        self.rho_w2, self.rho_b2 = _linear_init(k2, rho_hidden_dims, rho_out_dims)

        self._blk_cache = {}

    @property
    def out_dims(self):
        return self._rho_out_dims

    # kron(I_K, W) block-diagonal weights (bf16) so the fused per-node MLP runs in the
    # lane-dense [N, K*D] layout; all lane dims zero-padded to multiples of 128.
    def _block_weights(self, K):
        if K in self._blk_cache:
            return self._blk_cache[K]
        eye_k = jnp.eye(K, dtype=jnp.float32)
        blk = []
        for (eps, w1, b1, w2, b2) in self.phi_params:
            d_in, h = w1.shape
            d_out = w2.shape[1]
            Pin, Ph, Pout = (_round_up(K * d_in, 128), _round_up(K * h, 128),
                             _round_up(K * d_out, 128))
            w1b = jnp.pad(jnp.kron(eye_k, w1),
                          ((0, Pin - K * d_in), (0, Ph - K * h))).astype(jnp.bfloat16)
            b1b = jnp.pad(jnp.tile(b1, (1, K)), ((0, 0), (0, Ph - K * h)))
            w2b = jnp.pad(jnp.kron(eye_k, w2),
                          ((0, Ph - K * h), (0, Pout - K * d_out))).astype(jnp.bfloat16)
            b2b = jnp.pad(jnp.tile(b2, (1, K)), ((0, 0), (0, Pout - K * d_out)))
            blk.append((w1b, b1b, w2b, b2b))
        O = self.phi_out_dims
        Opad = _round_up(O, 128)
        Pout_last = _round_up(K * O, 128)
        pmat = jnp.pad(jnp.tile(jnp.eye(O, dtype=jnp.float32), (K, 1)),
                       ((0, Pout_last - K * O), (0, Opad - O)))
        self._blk_cache[K] = (blk, pmat)
        return blk, pmat

    def _phi(self, V, edge_index, num_graphs, carry_pad):
        N, K, M = V.shape
        assert N % num_graphs == 0, "graphs must have equal node counts"
        B, Ni = num_graphs, N // num_graphs
        O = self.phi_out_dims
        Opad = _round_up(O, 128)
        vmem_limit, tile_cap = _vmem_budget()
        n_layers = len(self.phi_params)
        use_kron = (self.mlp_mode == "kron") or (self.mlp_mode == "auto" and K <= 16)

        # --- node padding + tile selection ------------------------------------
        kd_list = [K * p[1].shape[0] for p in self.phi_params]
        Pin_max = max(_round_up(kd, 128) for kd in kd_list)
        if Ni <= tile_cap:
            Np = _round_up(Ni, 8)
            tm = Np
            tj = Np                      # collapsed contraction (single-pass aggregation)
        else:
            Np = _round_up(Ni, tile_cap)
            tm = tile_cap
            wbytes = 4 * 1024 * 1024
            full_set = 2 * (tm * Np) * 2 + 2 * (Np * Pin_max) * 2 + tm * Pin_max * 4 + wbytes
            tj = Np if full_set <= vmem_limit // 2 else tile_cap
        if B * (Np // tm) < 2 and Np >= 16 and Np % 16 == 0:
            tm = Np // 2                 # keep both v7x TensorCores busy

        # --- block-diagonal batched adjacency (bf16 exact for small int counts) --
        src, dst = edge_index[0], edge_index[1]
        adj0 = jnp.zeros((B, Np, Np), jnp.float32).at[
            dst // Ni, dst % Ni, src % Ni].add(1.0)
        eye = jnp.eye(Np, dtype=jnp.float32)[None]

        # --- lane-dense node features, bf16, padded rows/lanes -------------------
        Pin0 = _round_up(K * M, 128)
        x = V.astype(jnp.float32).reshape(B, Ni, K * M)
        x = jnp.pad(x, ((0, 0), (0, Np - Ni), (0, Pin0 - K * M))).astype(jnp.bfloat16)

        if carry_pad is None:
            carry_pad = jnp.zeros((B, Np, Opad), jnp.float32)
        else:
            assert carry_pad.shape == (B, Np, Opad), \
                "graph layout changed between accumulate calls"

        blk_params, pmat = self._block_weights(K) if use_kron else (None, None)

        pe_pad = pooled_pad = None
        for l, (eps, w1, b1, w2, b2) in enumerate(self.phi_params):
            last = (l == n_layers - 1)
            d_in, d_out = w1.shape[0], w2.shape[1]
            # (1+eps) self-term folded into the adjacency diagonal.
            adj_l = (adj0 + (1.0 + eps[0]) * eye).astype(jnp.bfloat16)

            if use_kron:
                w1b, b1b, w2b, b2b = blk_params[l]
                if not last:
                    x = _gin_layer_call(adj_l, x, w1b, b1b, w2b, b2b,
                                        tm=tm, tj=tj, out_dtype=jnp.bfloat16,
                                        vmem_limit=vmem_limit)
                else:
                    pe_pad, pooled_pad = _gin_layer_pool_call(
                        adj_l, x, w1b, b1b, w2b, b2b, pmat, carry_pad,
                        tm=tm, tj=tj, vmem_limit=vmem_limit)
            else:
                # de-kroned path (large K): aggregation kernel + row-tiled MLP in
                # (N*K, D) layout -> K x fewer MLP FLOPs and no K^2 weight blow-up.
                agg = _agg_call(adj_l, x, tm=tm, tj=tj, vmem_limit=vmem_limit)
                rows = agg[:, :, :K * d_in].reshape(B * Np * K, d_in)
                o_rows = mlp_forward(rows, w1, b1, w2, b2,
                                     out_dtype=jnp.float32 if last else jnp.bfloat16)
                o = o_rows.reshape(B, Np, K * d_out)
                if not last:
                    Pin_next = _round_up(K * d_out, 128)
                    x = jnp.pad(o, ((0, 0), (0, 0), (0, Pin_next - K * d_out)))
                else:
                    pe_pad = o
                    pooled = o.reshape(B, Np, K, d_out).sum(axis=2)
                    # TODO(synk): de-kron pooling/carry is plain XLA (tiny), not fused.
                    pooled_pad = carry_pad + jnp.pad(
                        pooled, ((0, 0), (0, 0), (0, Opad - d_out)))

        KO = K * O
        pe_full = pe_pad[:, :Ni, :KO].reshape(N, K, O)
        return pe_full, pooled_pad

    def _rho(self, x):
        return mlp_forward(x, self.rho_w1, self.rho_b1, self.rho_w2, self.rho_b2,
                           out_dtype=jnp.float32)

    def forward(self, Lambda, V, edge_index, accumulate, final, *, num_graphs=1):
        # Lambda is not used in the forward math (matches the reference module).
        N, K, _ = V.shape
        Ni = N // num_graphs
        O = self.phi_out_dims

        carry = self._rs_pad if (accumulate and self._rs_pad is not None) else None
        pe_full, pooled_pad = self._phi(V, edge_index, num_graphs, carry)
        pooled = pooled_pad[:, :Ni, :O].reshape(N, O)

        if accumulate:
            self._rs_pad = pooled_pad            # fused running_sum += PE.sum(dim=1)
            self.running_sum = pooled            # un-padded copy for inspection
            self.total += K
            x = pe_full
        else:
            x = self._rho(pooled / float(K))     # rho(PE.mean(dim=1))
        if accumulate and final:
            x = self._rho(pooled / float(self.total))
            self.running_sum = 0
            self._rs_pad = None
            self.total = 0
        return x

    __call__ = forward


# ----------------------------------------------------------------------------
# Pure-JAX reference (mirrors the kernels' bf16 MXU casts) for wiring checks.
# ----------------------------------------------------------------------------
def _ref_phi(model, V, edge_index):
    N, K, M = V.shape
    adj0 = jnp.zeros((N, N), jnp.float32).at[edge_index[1], edge_index[0]].add(1.0)
    x = V.astype(jnp.float32)
    for (eps, w1, b1, w2, b2) in model.phi_params:
        xf = x.reshape(N, -1)
        a = (adj0 + (1.0 + eps[0]) * jnp.eye(N, dtype=jnp.float32)).astype(jnp.bfloat16)
        s = jnp.dot(a, xf.astype(jnp.bfloat16), preferred_element_type=jnp.float32)
        z = s.reshape(N * K, -1)
        h = jnp.maximum(
            jnp.dot(z.astype(jnp.bfloat16), w1.astype(jnp.bfloat16),
                    preferred_element_type=jnp.float32) + b1, 0.0)
        o = jnp.dot(h.astype(jnp.bfloat16), w2.astype(jnp.bfloat16),
                    preferred_element_type=jnp.float32) + b2
        x = o.reshape(N, K, -1)
    return x, x.sum(axis=1)


def _ref_rho(model, x):
    h = jnp.maximum(
        jnp.dot(x.astype(jnp.bfloat16), model.rho_w1.astype(jnp.bfloat16),
                preferred_element_type=jnp.float32) + model.rho_b1, 0.0)
    return jnp.dot(h.astype(jnp.bfloat16), model.rho_w2.astype(jnp.bfloat16),
                   preferred_element_type=jnp.float32) + model.rho_b2


if __name__ == "__main__":
    key = jax.random.PRNGKey(0)
    B, Ni, M = 2, 8, 4                       # 2 graphs, 8 nodes each, 4 channels
    K = Ni                                   # dim-1 of V (per-graph sample count)
    hidden, phi_out = 16, 8
    rho_hidden, rho_out = 32, 16
    n_layers = 2
    N = B * Ni

    key, kv1, kv2, kp = jax.random.split(key, 4)
    V1 = jax.random.normal(kv1, (N, K, M), jnp.float32)
    V2 = jax.random.normal(kv2, (N, K, M), jnp.float32)
    Lambda = jnp.zeros((N,), jnp.float32)    # unused in forward math

    # bidirectional ring inside each graph (global node ids)
    src, dst = [], []
    for g in range(B):
        for i in range(Ni):
            a, b = g * Ni + i, g * Ni + (i + 1) % Ni
            src += [a, b]
            dst += [b, a]
    edge_index = jnp.array([src, dst], dtype=jnp.int32)   # [2, E]

    model = PEARL_PE1_Pallas(n_layers, M, hidden, phi_out, rho_hidden, rho_out, kp)

    # accumulate=True, final=False: returns phi output, accumulates running_sum
    PE1 = model(Lambda, V1, edge_index, accumulate=True, final=False, num_graphs=B)
    PE1 = jax.block_until_ready(PE1)
    rs = jax.block_until_ready(model.running_sum)
    assert PE1.shape == (N, K, phi_out) and PE1.dtype == jnp.float32
    assert rs.shape == (N, phi_out)
    assert model.total == K

    ref_pe, ref_sum = _ref_phi(model, V1, edge_index)
    assert jnp.allclose(PE1, ref_pe, rtol=5e-2, atol=5e-2)
    assert jnp.allclose(rs, ref_sum, rtol=5e-2, atol=5e-2)

    # accumulate=True, final=True: rho(running_sum / total), state reset
    out_final = model(Lambda, V2, edge_index, accumulate=True, final=True, num_graphs=B)
    out_final = jax.block_until_ready(out_final)
    assert out_final.shape == (N, rho_out)
    assert model.total == 0 and isinstance(model.running_sum, int)

    # accumulate=False: rho(mean over dim 1)
    out_mean = model(Lambda, V1, edge_index, accumulate=False, final=False, num_graphs=B)
    out_mean = jax.block_until_ready(out_mean)
    assert out_mean.shape == (N, rho_out)
    ref_mean = _ref_rho(model, ref_sum / float(K))
    assert jnp.allclose(out_mean, ref_mean, rtol=1e-1, atol=1e-1)

    # de-kroned per-node-MLP path (chosen automatically for large K); force it here.
    model_dk = PEARL_PE1_Pallas(n_layers, M, hidden, phi_out, rho_hidden, rho_out, kp,
                                mlp_mode="dekron")
    PE1_dk = model_dk(Lambda, V1, edge_index, accumulate=True, final=False, num_graphs=B)
    PE1_dk = jax.block_until_ready(PE1_dk)
    assert PE1_dk.shape == (N, K, phi_out)
    assert jnp.allclose(PE1_dk, ref_pe, rtol=5e-2, atol=5e-2)
    assert jnp.allclose(model_dk.running_sum, ref_sum, rtol=5e-2, atol=5e-2)

    print("KERNEL_OK")
</pallas_src>

<mosaic_0001>
module attributes {stable_mosaic.version = 11 : i64} {
  func.func @_gin_mlp_kernel(%arg0: i32, %arg1: i32, %arg2: i32, %arg3: memref<1x8x8xbf16, #tpu.memory_space<vmem>>, %arg4: memref<1x8x128xbf16, #tpu.memory_space<vmem>>, %arg5: memref<128x128xbf16, #tpu.memory_space<vmem>>, %arg6: memref<1x128xf32, #tpu.memory_space<vmem>>, %arg7: memref<128x128xbf16, #tpu.memory_space<vmem>>, %arg8: memref<1x128xf32, #tpu.memory_space<vmem>>, %arg9: memref<1x8x128xbf16, #tpu.memory_space<vmem>>, %arg10: memref<8x128xf32, #tpu.memory_space<vmem>>) attributes {dimension_semantics = [#tpu.dimension_semantics<parallel>, #tpu.dimension_semantics<parallel>, #tpu.dimension_semantics<arbitrary>], iteration_bounds = array<i64: 2, 1, 1>, scalar_prefetch = 0 : i64, scratch_operands = 1 : i64, tpu.core_type = #tpu.core_type<tc>, window_params = [{transform_indices = @transform_0, window_bounds = array<i64: 1, 8, 8>}, {transform_indices = @transform_1, window_bounds = array<i64: 1, 8, 128>}, {pipeline_mode = #tpu.pipeline_mode<synchronous>, transform_indices = @transform_2, window_bounds = array<i64: 128, 128>}, {pipeline_mode = #tpu.pipeline_mode<synchronous>, transform_indices = @transform_3, window_bounds = array<i64: 1, 128>}, {pipeline_mode = #tpu.pipeline_mode<synchronous>, transform_indices = @transform_4, window_bounds = array<i64: 128, 128>}, {pipeline_mode = #tpu.pipeline_mode<synchronous>, transform_indices = @transform_5, window_bounds = array<i64: 1, 128>}, {transform_indices = @transform_6, window_bounds = array<i64: 1, 8, 128>}]} {
    %c0 = arith.constant 0 : index
    %c0_0 = arith.constant 0 : index
    %c0_1 = arith.constant 0 : index
    %0 = vector.load %arg3[%c0, %c0_0, %c0_1] : memref<1x8x8xbf16, #tpu.memory_space<vmem>>, vector<1x8x8xbf16>
    %1 = vector.shape_cast %0 : vector<1x8x8xbf16> to vector<8x8xbf16>
    %c0_2 = arith.constant 0 : index
    %c0_3 = arith.constant 0 : index
    %c0_4 = arith.constant 0 : index
    %2 = vector.load %arg4[%c0_2, %c0_3, %c0_4] : memref<1x8x128xbf16, #tpu.memory_space<vmem>>, vector<1x8x128xbf16>
    %3 = vector.shape_cast %2 : vector<1x8x128xbf16> to vector<8x128xbf16>
    %cst = arith.constant dense<0.000000e+00> : vector<8x128xf32>
    %4 = tpu.matmul %1, %3, %cst {dimension_numbers = #tpu.dot_dimension_numbers<[1], [0], [0], [1], [0, 0, 1, 1], [], []>} : vector<8x8xbf16>, vector<8x128xbf16>, vector<8x128xf32> -> vector<8x128xf32>
    %c0_i32 = arith.constant 0 : i32
    %5 = arith.cmpi eq, %arg2, %c0_i32 : i32
    %6 = arith.extui %5 : i1 to i32
    %c0_i32_5 = arith.constant 0 : i32
    %7 = arith.cmpi ne, %6, %c0_i32_5 : i32
    scf.if %7 {
      %c0_10 = arith.constant 0 : index
      %c0_11 = arith.constant 0 : index
      %14 = vector.load %arg10[%c0_10, %c0_11] : memref<8x128xf32, #tpu.memory_space<vmem>>, vector<8x128xf32>
      tpu.vector_store %arg10[%c0_10, %c0_11], %4 {strides = array<i32>} : memref<8x128xf32, #tpu.memory_space<vmem>>, vector<8x128xf32>,
    } else {
    }
    %c0_i32_6 = arith.constant 0 : i32
    %8 = arith.cmpi ne, %arg2, %c0_i32_6 : i32
    %9 = arith.extui %8 : i1 to i32
    %c0_i32_7 = arith.constant 0 : i32
    %10 = arith.cmpi ne, %9, %c0_i32_7 : i32
    scf.if %10 {
      %c0_10 = arith.constant 0 : index
      %c0_11 = arith.constant 0 : index
      %14 = vector.load %arg10[%c0_10, %c0_11] : memref<8x128xf32, #tpu.memory_space<vmem>>, vector<8x128xf32>
      %15 = arith.addf %14, %4 : vector<8x128xf32>
      %c0_12 = arith.constant 0 : index
      %c0_13 = arith.constant 0 : index
      %16 = vector.load %arg10[%c0_12, %c0_13] : memref<8x128xf32, #tpu.memory_space<vmem>>, vector<8x128xf32>
      tpu.vector_store %arg10[%c0_12, %c0_13], %15 {strides = array<i32>} : memref<8x128xf32, #tpu.memory_space<vmem>>, vector<8x128xf32>,
    } else {
    }
    %c0_i32_8 = arith.constant 0 : i32
    %11 = arith.cmpi eq, %arg2, %c0_i32_8 : i32
    %12 = arith.extui %11 : i1 to i32
    %c0_i32_9 = arith.constant 0 : i32
    %13 = arith.cmpi ne, %12, %c0_i32_9 : i32
    scf.if %13 {
      %c0_10 = arith.constant 0 : index
      %c0_11 = arith.constant 0 : index
      %14 = vector.load %arg10[%c0_10, %c0_11] : memref<8x128xf32, #tpu.memory_space<vmem>>, vector<8x128xf32>
      %15 = arith.truncf %14 : vector<8x128xf32> to vector<8x128xbf16>
      %c0_12 = arith.constant 0 : index
      %c0_13 = arith.constant 0 : index
      %16 = vector.load %arg5[%c0_12, %c0_13] : memref<128x128xbf16, #tpu.memory_space<vmem>>, vector<128x128xbf16>
      %cst_14 = arith.constant dense<0.000000e+00> : vector<8x128xf32>
      %17 = tpu.matmul %15, %16, %cst_14 {dimension_numbers = #tpu.dot_dimension_numbers<[1], [0], [0], [1], [0, 0, 1, 1], [], []>} : vector<8x128xbf16>, vector<128x128xbf16>, vector<8x128xf32> -> vector<8x128xf32>
      %c0_15 = arith.constant 0 : index
      %c0_16 = arith.constant 0 : index
      %18 = vector.load %arg6[%c0_15, %c0_16] : memref<1x128xf32, #tpu.memory_space<vmem>>, vector<1x128xf32>
      %19 = vector.broadcast %18 : vector<1x128xf32> to vector<8x128xf32>
      %20 = arith.addf %17, %19 : vector<8x128xf32>
      %cst_17 = arith.constant 0.000000e+00 : f32
      %21 = vector.broadcast %cst_17 : f32 to vector<8x128xf32>
      %22 = arith.maximumf %20, %21 : vector<8x128xf32>
      %23 = arith.truncf %22 : vector<8x128xf32> to vector<8x128xbf16>
      %c0_18 = arith.constant 0 : index
      %c0_19 = arith.constant 0 : index
      %24 = vector.load %arg7[%c0_18, %c0_19] : memref<128x128xbf16, #tpu.memory_space<vmem>>, vector<128x128xbf16>
      %cst_20 = arith.constant dense<0.000000e+00> : vector<8x128xf32>
      %25 = tpu.matmul %23, %24, %cst_20 {dimension_numbers = #tpu.dot_dimension_numbers<[1], [0], [0], [1], [0, 0, 1, 1], [], []>} : vector<8x128xbf16>, vector<128x128xbf16>, vector<8x128xf32> -> vector<8x128xf32>
      %c0_21 = arith.constant 0 : index
      %c0_22 = arith.constant 0 : index
      %26 = vector.load %arg8[%c0_21, %c0_22] : memref<1x128xf32, #tpu.memory_space<vmem>>, vector<1x128xf32>
      %27 = vector.broadcast %26 : vector<1x128xf32> to vector<8x128xf32>
      %28 = arith.addf %25, %27 : vector<8x128xf32>
      %29 = arith.truncf %28 : vector<8x128xf32> to vector<8x128xbf16>
      %c0_23 = arith.constant 0 : index
      %c0_24 = arith.constant 0 : index
      %c0_25 = arith.constant 0 : index
      %30 = vector.load %arg9[%c0_23, %c0_24, %c0_25] : memref<1x8x128xbf16, #tpu.memory_space<vmem>>, vector<1x8x128xbf16>
      %31 = vector.shape_cast %30 : vector<1x8x128xbf16> to vector<8x128xbf16>
      %32 = vector.shape_cast %29 : vector<8x128xbf16> to vector<1x8x128xbf16>
      tpu.vector_store %arg9[%c0_23, %c0_24, %c0_25], %32 {strides = array<i32>} : memref<1x8x128xbf16, #tpu.memory_space<vmem>>, vector<1x8x128xbf16>,
    } else {
    }
    return
  }
  func.func @transform_0(%arg0: i32, %arg1: i32, %arg2: i32) -> (i32, i32, i32) {
    %c0_i32 = arith.constant 0 : i32
    return %arg0, %arg1, %arg2 : i32, i32, i32
  }
  func.func @transform_1(%arg0: i32, %arg1: i32, %arg2: i32) -> (i32, i32, i32) {
    %c0_i32 = arith.constant 0 : i32
    %c0_i32_0 = arith.constant 0 : i32
    return %arg0, %arg2, %c0_i32 : i32, i32, i32
  }
  func.func @transform_2(%arg0: i32, %arg1: i32, %arg2: i32) -> (i32, i32) {
    %c0_i32 = arith.constant 0 : i32
    %c0_i32_0 = arith.constant 0 : i32
    %c0_i32_1 = arith.constant 0 : i32
    return %c0_i32, %c0_i32_0 : i32, i32
  }
  func.func @transform_3(%arg0: i32, %arg1: i32, %arg2: i32) -> (i32, i32) {
    %c0_i32 = arith.constant 0 : i32
    %c0_i32_0 = arith.constant 0 : i32
    %c0_i32_1 = arith.constant 0 : i32
    return %c0_i32, %c0_i32_0 : i32, i32
  }
  func.func @transform_4(%arg0: i32, %arg1: i32, %arg2: i32) -> (i32, i32) {
    %c0_i32 = arith.constant 0 : i32
    %c0_i32_0 = arith.constant 0 : i32
    %c0_i32_1 = arith.constant 0 : i32
    return %c0_i32, %c0_i32_0 : i32, i32
  }
  func.func @transform_5(%arg0: i32, %arg1: i32, %arg2: i32) -> (i32, i32) {
    %c0_i32 = arith.constant 0 : i32
    %c0_i32_0 = arith.constant 0 : i32
    %c0_i32_1 = arith.constant 0 : i32
    return %c0_i32, %c0_i32_0 : i32, i32
  }
  func.func @transform_6(%arg0: i32, %arg1: i32, %arg2: i32) -> (i32, i32, i32) {
    %c0_i32 = arith.constant 0 : i32
    %c0_i32_0 = arith.constant 0 : i32
    return %arg0, %arg1, %c0_i32 : i32, i32, i32
  }
}

</mosaic_0001>

<bundles_post_ra>
// kernel: tpu_custom_call.1
= control target key start
LH: loop header
LB: loop body
LE: loop exit
PB: predicated region body
PF: predicated region fallthrough
CT: control target
= control target key end

     0   :  { %s1498_s0 = inlined_call_operand.hbm [shape: bf16[2,8,8], index: 0, kind: input, shape index: {}]   ;;  %s1499_s1 = inlined_call_operand.hbm [shape: bf16[2,8,128], index: 1, kind: input, shape index: {}]   ;;  %s1500_s2 = inlined_call_operand.hbm [shape: bf16[128,128], index: 2, kind: input, shape index: {}]   ;;  %s1501_s3 = inlined_call_operand.vmem [shape: f32[1,128], index: 3, kind: input, shape index: {}]   ;;  %s1502_s4 = inlined_call_operand.hbm [shape: bf16[128,128], index: 4, kind: input, shape index: {}]   ;;  %s1503_s5 = inlined_call_operand.vmem [shape: f32[1,128], index: 5, kind: input, shape index: {}]   ;;  %s1504_s6 = inlined_call_operand.hbm [shape: bf16[2,8,128], index: 6, kind: output, shape index: {}]  }
   0x1   :  { %1506 = sst [smem:[#allocation17_spill]] %s1498_s0 }
   0x2   :  { %1507 = sst [smem:[#allocation18_spill]] %s1499_s1 }
   0x3   :  { %1508 = sst [smem:[#allocation19_spill]] %s1500_s2 }
   0x4   :  { %1509 = sst [smem:[#allocation20_spill]] %s1502_s4 }
   0x5   :  { %11 = vsyncpa [#allocation4], 0 }
   0x6   :  { %13 = vsyncpa [#allocation4 + $0x1], 0 }
   0x7   :  { %14 = vsyncpa [#allocation7], 0 }
   0x8   :  { %16 = vsyncpa [#allocation7 + $0x1], 0 }
   0x9   :  { %17 = vsyncpa [#allocation10], 0 }
   0xa   :  { %18 = vsyncpa [#allocation5], 0 }
   0xb   :  { %20 = vsyncpa [#allocation5 + $0x1], 0  ;;  %s1258_s21 = smov 0   ;;  %s1260_s22 = smov 0  }
   0xc   :  { %s1262_s23 = smov 0   ;;  %s1264_s24 = smov 0  }
   0xd   :  { %s1266_s25 = smov 0   ;;  %s1268_s26 = smov 0  }
   0xe LB: > { %s1289_s27 = sadd.s32 4294967295, %s1212_s26   ;;  %s800_s28 = sadd.s32 4294967294, %s1212_s26   ;;  %s1212_s26 = sphi %s1268_s26, %s26_s26   ;;  %s1208_s25 = sphi %s1266_s25, %s1531_s25   ;;  %s1204_s24 = sphi %s1264_s24, %s1530_s24   ;;  %s1200_s23 = sphi %s1262_s23, %s1529_s23   ;;  %s1196_s22 = sphi %s1260_s22, %s1528_s22   ;;  %s1192_s21 = sphi %s1258_s21, %s1527_s21  }
   0xf   : > { %p69_p0 = scmp.ne.s32.totalorder %s1196_s22, %s1192_s21  ;;  %p1505_p1 = scmp.eq.s32.totalorder %s1289_s27, 0 }
  0x10   : > { %p213_p3 = scmp.eq.s32.totalorder %s800_s28, 1  ;;  %p801_p5 = scmp.ge.s32.totalorder %s1212_s26, 1 }
  0x11   : > { %p1298_p4 = por %p1505_p1, %p69_p0  ;;  %p220_p7 = scmp.lt.s32.totalorder %s1212_s26, 3 }
  0x12   : > { %p1303_p6 = por %p213_p3, %p69_p0  ;;  %s1214_s8 = smov [#allocation8]  }
  0x13   : > { %p1308_p8 = pnand %p801_p5, %p220_p7  ;;  %s232_s9 = sshll.u32 %s1214_s8, 4  ;;  %s233_s9 = int_to_ptr.vmem [resolvable:$true] %s232_s9 }
  0x14   : > { %s1511_s30 = scalar_select %p1303_p6, 1, 0 }
  0x15   : > { %p918_p9 = pneg %p1308_p8  ;;  %s1215_s11 = smov [#allocation9]  }
  0x16   : > { %s248_s12 = sshll.u32 %s1215_s11, 4  ;;  %s1023_s13 = scalar_lea.vmem %s233_s9, 1024  ;;  %s249_s12 = int_to_ptr.vmem [resolvable:$true] %s248_s12 }
  0x17   : > { %p1317_p11 = pnand %p918_p9, %p1505_p1  ;;  %p1024_p13 = scmp.ne.s32.totalorder %s233_s9, %s1023_s13 }
  0x18   : > { %p1031_p5 = scmp.lt.s32.totalorder %s233_s9, %s233_s9  ;;  %p1032_p7 = scmp.lt.s32.totalorder %s1023_s13, %s1023_s13 }
  0x19   : > { %p1014_p12 = pneg %p1317_p11 }
  0x1a   : > { %p1033_p10 = por %p1032_p7, %p1031_p5 }
  0x1b   : > { %p1026_p0 = pnand %p1024_p13, %p1014_p12 }
  0x1d   : > { %p1027_p3 = pneg %p1026_p0 }
  0x1f   : > { %p1034_p9 = pnand %p1033_p10, %p1027_p3 }
  0x21   : > { %1037 = shalt.err (!%p1034_p9)
}
  0x22   : > { %s1216_s14 = smov 64   ;;  %s1217_s15 = smov 4  }
  0x23   : > { %s1514_s2 = sld [smem:[#allocation19_spill]]  ;;  %s1049_s18 = scalar_lea.vmem %s249_s12, 1024 }
  0x24   : > { %p1050_p1 = scmp.ne.s32.totalorder %s249_s12, %s1049_s18  ;;  %p1057_p2 = scmp.lt.s32.totalorder %s249_s12, %s249_s12 }
  0x25   : > { %p1058_p6 = scmp.lt.s32.totalorder %s1049_s18, %s1049_s18 }
  0x26   : > { %p1052_p13 = pnand %p1050_p1, %p1014_p12 }
  0x27   : > { %p1059_p5 = por %p1058_p6, %p1057_p2 }
  0x28   : > { %p1053_p0 = pneg %p1052_p13 }
  0x29   : > { %921 = dma.hbm_to_vmem [thread:$0]  (!%p1317_p11), %s1514_s2, 1024, %s233_s9, [#allocation7], %s1216_s14, %s1216_s14, %s1217_s15  }
  0x2a   : > { %p1060_p10 = pnand %p1059_p5, %p1053_p0 }
  0x2c   : > { %1063 = shalt.err (!%p1060_p10)
}
  0x2d   : > { %s1515_s4 = sld [smem:[#allocation20_spill]]  ;;  %s45_s28 = sadd.s32 1, %s1208_s25 }
  0x2e   : > { %s56_s8 = sadd.s32 1, %s1200_s23  ;;  %p47_p1 = scmp.ge.s32.totalorder %s45_s28, 2 }
  0x2f   : > { %p63_p2 = scmp.ne.s32.totalorder %s1200_s23, %s1196_s22  ;;  %p64_p6 = scmp.eq.s32.totalorder %s1212_s26, 0 }
  0x30   : > { %p938_p12 = scmp.lt.s32.totalorder %s1212_s26, 2  ;;  %s1533_s28 = smov (%p47_p1, %s45_s28), 0 }
  0x31   : > { %p65_p3 = por %p64_p6, %p63_p2  ;;  %p1516_p7 = scmp.eq.s32.totalorder %s1289_s27, 1 }
  0x32   : > { %s49_s10 = ssub.s32 %s1208_s25, %s1533_s28  ;;  %s265_s11 = sand.u32 1, %s1200_s23  }
  0x33   : > { %924 = dma.hbm_to_vmem [thread:$0]  (!%p1317_p11), %s1515_s4, 1024, %s249_s12, [#allocation10], %s1216_s14, %s1216_s14, %s1217_s15  }
  0x34   : > { %p1349_p9 = por %p1516_p7, %p63_p2  ;;  %p54_p13 = scmp.eq.s32.totalorder %s49_s10, 0 }
  0x35   : > { %s805_s12 = sshll.u32 %s265_s11, 2  ;;  %s806_s13 = sshll.u32 %s1208_s25, 6 }
  0x36   : > { %s1358_s14 = scalar_select %p54_p13, %s1200_s23, %s56_s8  }
  0x37   : > { %s1518_s0 = sld [smem:[#allocation17_spill]]  ;;  %s269_s18 = scalar_lea.vmem [#allocation3], %s805_s12 }
  0x38   : > { %s278_s19 = sshll.u32 %s269_s18, 4  ;;  %p1365_p11 = pnand %p938_p12, %p65_p3  ;;  %s279_s19 = int_to_ptr.vmem [resolvable:$true] %s278_s19 }
  0x39   : > { %s1520_s1 = sld [smem:[#allocation18_spill]]  ;;  %s266_s8 = scalar_lea.sflag [#allocation4], %s265_s11 }
  0x3a   : > { %p1066_p0 = pneg %p1365_p11  ;;  %s1077_s15 = scalar_lea.vmem %s279_s19, 64 }
  0x3b   : > { %p1078_p5 = scmp.ne.s32.totalorder %s279_s19, %s1077_s15  ;;  %s1218_s16 = smov [#allocation3]  }
  0x3c   : > { %s1082_s18 = sshll.u32 %s1218_s16, 4  ;;  %s1083_s18 = int_to_ptr.vmem [resolvable:$false] %s1082_s18 }
  0x3d   : > { %s276_s17 = scalar_lea.hbm %s1518_s0, %s806_s13  ;;  %p1080_p10 = pnand %p1078_p5, %p1066_p0 }
  0x3e   : > { %s1084_s0 = scalar_lea.vmem %s1083_s18, 128  ;;  %p1085_p2 = scmp.lt.s32.totalorder %s279_s19, %s1083_s18 }
  0x3f   : > { %s1372_s4 = scalar_lea.hbm %s1520_s1, %s806_s13  ;;  %p1081_p1 = pneg %p1080_p10 }
  0x40   : > { %p1086_p6 = scmp.lt.s32.totalorder %s1084_s0, %s1077_s15 }
  0x42   : > { %p1087_p12 = por %p1086_p6, %p1085_p2 }
  0x44   : > { %p1088_p3 = pnand %p1087_p12, %p1081_p1 }
  0x46   : > { %1091 = shalt.err (!%p1088_p3)
}
  0x47   : > { %928 = dma.hbm_to_vmem [thread:$0]  (!%p1365_p11), %s276_s17, 64, %s279_s19, %s266_s8  }
  0x48   : > { %s285_s2 = sand.u32 1, %s1212_s26   ;;  %s289_s11 = scalar_lea.vmem [#allocation6], %s805_s12 }
  0x49   : > { %s297_s13 = sshll.u32 %s289_s11, 4  ;;  %s286_s10 = scalar_lea.sflag [#allocation7], %s285_s2  ;;  %s298_s13 = int_to_ptr.vmem [resolvable:$true] %s297_s13 }
  0x4a   : > { %s1105_s1 = scalar_lea.vmem %s298_s13, 64  ;;  %s1219_s0 = smov [#allocation6]  }
  0x4b   : > { %p1106_p7 = scmp.ne.s32.totalorder %s298_s13, %s1105_s1  ;;  %s1110_s15 = sshll.u32 %s1219_s0, 4  ;;  %s1111_s15 = int_to_ptr.vmem [resolvable:$false] %s1110_s15 }
  0x4c   : > { %s1112_s16 = scalar_lea.vmem %s1111_s15, 128  ;;  %p1113_p10 = scmp.lt.s32.totalorder %s298_s13, %s1111_s15 }
  0x4d   : > { %p1108_p13 = pnand %p1106_p7, %p1066_p0  ;;  %p1114_p1 = scmp.lt.s32.totalorder %s1112_s16, %s1105_s1 }
  0x4f   : > { %p1109_p5 = pneg %p1108_p13  ;;  %p1115_p2 = por %p1114_p1, %p1113_p10 }
  0x51   : > { %p1116_p6 = pnand %p1115_p2, %p1109_p5 }
  0x53   : > { %1119 = shalt.err (!%p1116_p6)
}
  0x54   : > { %931 = dma.hbm_to_vmem [thread:$0]  (!%p1365_p11), %s1372_s4, 64, %s298_s13, %s286_s10  }
  0x55   : > { %306 = sbr.rel (%p1308_p8) target bundleno = 711 (0x2c7), region = 44  ;;  %s1391_s12 = sand.u32 (!%p1308_p8), 1, %s1196_s22  }
  0x56   : > { %s1394_s17 = sshll.u32 (!%p1308_p8), %s1391_s12, 2  ;;  %s309_s1 = scalar_lea.sflag (!%p1308_p8), [#allocation4], %s1391_s12 }
  0x57   : > { %s312_s19 = scalar_lea.vmem (!%p1308_p8), [#allocation3], %s1394_s17 }
  0x5a   : > { %1171 = dma.done.wait (%p1298_p4), %s309_s1, 64  }
  0x5b   : > { %1173 = vsyncadd (%p1298_p4), %s309_s1, 4294967232  ;;  %s317_s4 = sand.u32 1, %s1289_s27   ;;  %s321_s20 = scalar_lea.vmem [#allocation6], %s1394_s17 }
  0x5c   : > { %s318_s7 = scalar_lea.sflag [#allocation7], %s317_s4 }
  0x5d   : > { %1175 = dma.done.wait (%p1298_p4), %s318_s7, 64  }
  0x5e   : > { %1177 = vsyncadd (%p1298_p4), %s318_s7, 4294967232  ;;  %p1521_p8 = scmp.eq.s32.totalorder %s1289_s27, 0 }
  0x60   : > { %1179 = dma.done.wait (%p1521_p8), [#allocation7], 1024   ;;  %p1522_p11 = pmov %p1521_p8 }
  0x61   : > { %p1523_p0 = pmov %p1521_p8 }
  0x62   : > { %1181 = vsyncadd (%p1522_p11), [#allocation7], 4294966272 }
  0x63   : > { %1183 = dma.done.wait (%p1523_p0), [#allocation10], 1024   ;;  %p1524_p12 = pmov %p1523_p0 }
  0x64   : > { %v1220_v0 = vmov 0.0   ;;  %vm1221_vm0 = vmmov 0   ;;  %vm370_vm1 = vcmask 1043456   ;;  %v365_v1 = vld [vmem:[%s321_s20] sm:$0xf]  ;;  %vm366_vm2 = vcmask 64512  }
  0x65   : > { %1185 = vsyncadd (%p1524_p12), [#allocation10], 4294966272  ;;  %858 = vmatprep.subr.bf16.mxu0 %v1220_v0  ;;  %860 = vmatprep.mubr.msk.bf16.mxu0 %vm1221_vm0, %v1220_v0  ;;  %v372_v2 = vsel %vm370_vm1, %v365_v1, 0  ;;  %v996_v3 = vld [vmem:[#allocation8 + $0x38] sm:$0xff]   ;;  %v364_v4 = vld [vmem:[%s312_s19] sm:$0xf] }
  0x66   : > { %864 = vmatprep.subr.bf16.mxu1 %v1220_v0  ;;  %880 = vmatprep.mubr.msk.bf16.mxu1 %vm1221_vm0, %v1220_v0  ;;  %v997_v5 = vld [vmem:[#allocation8 + $0x30] sm:$0xff]   ;;  %v998_v6 = vld [vmem:[#allocation8 + $0x28] sm:$0xff]   ;;  %v999_v7 = vld [vmem:[#allocation8 + $0x20] sm:$0xff]   ;;  %s835_s2 = sshll.u32 %s1204_s24, 6  ;;  %s362_s11 = scalar_lea.vmem [#allocation11], %s1394_s17 }
  0x67   : > { %859 = vmatpush3.bf16.msra.mxu0 %v372_v2  ;;  %865 = vmatpush3.bf16.msra.mxu1 %v996_v3  ;;  %v1000_v8 = vld [vmem:[#allocation8 + $0x18] sm:$0xff]   ;;  %v1001_v9 = vld [vmem:[#allocation8 + $0x10] sm:$0xff]   ;;  %v1002_v10 = vld [vmem:[#allocation8 + $0x8] sm:$0xff]   ;;  %s672_s13 = sshll.u32 %s362_s11, 4  ;;  %s1450_s15 = scalar_lea.hbm %s1504_s6, %s835_s2  ;;  %s1452_s13 = int_to_ptr.vmem [resolvable:$true] %s672_s13 }
  0x68   : > { %884 = vmatprep.subr.bf16.mxu0 %v1220_v0  ;;  %866 = vmatprep.subr.bf16.mxu1 %v1220_v0  ;;  %v1003_v11 = vld [vmem:[#allocation8] sm:$0xff]   ;;  %v1004_v12 = vld [vmem:[#allocation9 + $0x38] sm:$0xff]   ;;  %v1005_v13 = vld [vmem:[#allocation9 + $0x30] sm:$0xff]   ;;  %s658_s16 = scalar_lea.sflag [#allocation5], %s1391_s12  ;;  %s1120_s24 = scalar_lea.vmem %s1452_s13, 64 }
  0x69   : > { %v1006_v14 = vld [vmem:[#allocation9 + $0x28] sm:$0xff]   ;;  %v1007_v15 = vld [vmem:[#allocation9 + $0x20] sm:$0xff]   ;;  %v1008_v16 = vld [vmem:[#allocation9 + $0x18] sm:$0xff]   ;;  %p1121_p4 = scmp.ne.s32.totalorder %s1452_s13, %s1120_s24  ;;  %s1222_s17 = smov [#allocation11]  }
  0x6a   : > { %861 = vmatmul.mubr.msk.bf16.vlgmr.msra.gmra.mxu0 %vm366_vm2, %v364_v4  ;;  %v1009_v17 = vld [vmem:[#allocation9 + $0x10] sm:$0xff]   ;;  %v1010_v23 = vld [vmem:[#allocation9 + $0x8] sm:$0xff]   ;;  %v1011_v24 = vld [vmem:[#allocation9] sm:$0xff]   ;;  %s1124_s1 = sshll.u32 %s1222_s17, 4  ;;  %s1125_s1 = int_to_ptr.vmem [resolvable:$false] %s1124_s1 }
  0x6b   : > { %900 = vmatprep.mubr.msk.bf16.mxu0 %vm1221_vm0, %v1220_v0  ;;  %867 = vmatpush3.bf16.msra.mxu1 %v997_v5  ;;  %v816_v25 = vld [vmem:[%s1501_s3] ss:$0 sm:$0xff]  ;;  %p1122_p3 = pnand %p1121_p4, %p1349_p9  ;;  %s1126_s19 = scalar_lea.vmem %s1125_s1, 128 }
  0x6c   : > { %868 = vmatprep.subr.bf16.mxu1 %v1220_v0  ;;  %885 = vmatpush3.bf16.msra.mxu0 %v1004_v12  ;;  %v825_v33 = vld [vmem:[%s1503_s5] ss:$0 sm:$0xff]  ;;  %p1127_p13 = scmp.lt.s32.totalorder %s1452_s13, %s1125_s1  ;;  %p1128_p5 = scmp.lt.s32.totalorder %s1126_s19, %s1120_s24 }
  0x6d   : > { %886 = vmatprep.subr.bf16.mxu0 %v1220_v0  ;;  %p1123_p7 = pneg %p1122_p3 }
  0x6e   : > { %p1129_p10 = por %p1128_p5, %p1127_p13 }
  0x6f   : > { %869 = vmatpush3.bf16.msra.mxu1 %v998_v6 }
  0x70   : > { %870 = vmatprep.subr.bf16.mxu1 %v1220_v0  ;;  %887 = vmatpush3.bf16.msra.mxu0 %v1005_v13  ;;  %p1130_p1 = pnand %p1129_p10, %p1123_p7 }
  0x71   : > { %888 = vmatprep.subr.bf16.mxu0 %v1220_v0 }
  0x73   : > { %871 = vmatpush3.bf16.msra.mxu1 %v999_v7 }
  0x74   : > { %872 = vmatprep.subr.bf16.mxu1 %v1220_v0  ;;  %889 = vmatpush3.bf16.msra.mxu0 %v1006_v14 }
  0x75   : > { %890 = vmatprep.subr.bf16.mxu0 %v1220_v0 }
  0x77   : > { %873 = vmatpush3.bf16.msra.mxu1 %v1000_v8 }
  0x78   : > { %874 = vmatprep.subr.bf16.mxu1 %v1220_v0  ;;  %891 = vmatpush3.bf16.msra.mxu0 %v1007_v15 }
  0x79   : > { %892 = vmatprep.subr.bf16.mxu0 %v1220_v0 }
  0x7b   : > { %875 = vmatpush3.bf16.msra.mxu1 %v1001_v9 }
  0x7c   : > { %876 = vmatprep.subr.bf16.mxu1 %v1220_v0  ;;  %893 = vmatpush3.bf16.msra.mxu0 %v1008_v16 }
  0x7d   : > { %894 = vmatprep.subr.bf16.mxu0 %v1220_v0 }
  0x7f   : > { %877 = vmatpush3.bf16.msra.mxu1 %v1002_v10 }
  0x80   : > { %878 = vmatprep.subr.bf16.mxu1 %v1220_v0  ;;  %895 = vmatpush3.bf16.msra.mxu0 %v1009_v17 }
  0x81   : > { %896 = vmatprep.subr.bf16.mxu0 %v1220_v0 }
  0x83   : > { %879 = vmatpush3.bf16.msra.mxu1 %v1003_v11 }
  0x84   : > { %897 = vmatpush3.bf16.msra.mxu0 %v1010_v23 }
  0x85   : > { %898 = vmatprep.subr.bf16.mxu0 %v1220_v0 }
  0x88   : > { %899 = vmatpush3.bf16.msra.mxu0 %v1011_v24 }
 0x12a   : > { %v408_v18 = vpop.f32.mrf.mxu0 }
 0x12b   : > { %v430_v19 = vpack.c.bf16 %v408_v18, %v408_v18 }
 0x12c   : > { %v862_v20 = vpop.f32.mrf.mxu0 }
 0x12d   : > { %881 = vmatmul.mubr.bf16.vlgmr.msra.gmra.mxu1 %v430_v19 }
 0x12e   : > { %v411_v21 = vpop.f32.mrf.mxu0 }
 0x130   : > { %v863_v22 = vpop.f32.mrf.mxu0 }
 0x1ed   : > { %v536_v26 = vpop.f32.mrf.mxu1 }
 0x1ee   : > { %v537_v27 = vadd.f32 %v816_v25, %v536_v26 }
 0x1ef   : > { %v882_v28 = vpop.f32.mrf.mxu1 }
 0x1f0   : > { %v542_v29 = vmax.f32 %v537_v27, 0.0 }
 0x1f1   : > { %v539_v30 = vpop.f32.mrf.mxu1 }
 0x1f2   : > { %v543_v31 = vpack.c.bf16 %v542_v29, %v542_v29 }
 0x1f3   : > { %v883_v32 = vpop.f32.mrf.mxu1 }
 0x1f4   : > { %901 = vmatmul.mubr.bf16.vlgmr.msra.gmra.mxu0 %v543_v31 }
 0x2b4   : > { %v649_v34 = vpop.f32.mrf.mxu0 }
 0x2b5   : > { %v650_v35 = vadd.f32 %v825_v33, %v649_v34 }
 0x2b6   : > { %v902_v36 = vpop.f32.mrf.mxu0 }
 0x2b7   : > { %v655_v37 = vpack.c.bf16 %v650_v35, %v650_v35 }
 0x2b8   : > { %v652_v38 = vpop.f32.mrf.mxu0 }
 0x2b9   : > { %656 = vst [vmem:[%s362_s11] sm:$0xf] %v655_v37 }
 0x2ba   : > { %v903_v39 = vpop.f32.mrf.mxu0 }
 0x2bb   : > { %1133 = shalt.err (!%p1130_p1)
}
 0x2bc   : > { %s1134_s4 = scalar_lea.hbm %s1450_s15, 64  ;;  %s1138_s20 = scalar_lea.hbm %s1504_s6, 128 }
 0x2bd   : > { %p1135_p2 = scmp.ne.s32.totalorder %s1450_s15, %s1134_s4  ;;  %p1139_p11 = scmp.lt.s32.totalorder %s1450_s15, %s1504_s6 }
 0x2be   : > { %p1140_p0 = scmp.lt.s32.totalorder %s1138_s20, %s1134_s4 }
 0x2bf   : > { %p1136_p6 = pnand %p1135_p2, %p1349_p9 }
 0x2c0   : > { %p1141_p12 = por %p1140_p0, %p1139_p11 }
 0x2c1   : > { %p1137_p8 = pneg %p1136_p6 }
 0x2c3   : > { %p1142_p4 = pnand %p1141_p12, %p1137_p8 }
 0x2c5   : > { %1145 = shalt.err (!%p1142_p4)
}
 0x2c6   : > { %916 = dma.vmem_to_hbm [thread:$0]  (%p1349_p9), %s1452_s13, 64, %s1450_s15, %s658_s16  }
 0x2c7 PF: > { %s684_s8 = sand.u32 1, %s1192_s21   ;;  %p1525_p3 = scmp.ne.s32.totalorder %s1511_s30, 0 }
 0x2c8   : > { %p1526_p7 = scmp.ge.s32.totalorder %s1212_s26, 2  ;;  %s685_s18 = scalar_lea.sflag [#allocation5], %s684_s8 }
 0x2ca   : > { %p933_p13 = pnand %p1526_p7, %p1525_p3 }
 0x2cc   : > { %p934_p5 = pneg %p933_p13 }
 0x2ce   : > { %1187 = dma.done.wait (%p934_p5), %s685_s18, 64  }
 0x2cf   : > { %1189 = vsyncadd (%p934_p5), %s685_s18, 4294967232  ;;  %s26_s26 = sadd.s32 1, %s1212_s26   ;;  %s1527_s21 = smov %s1196_s22 }
 0x2d0   : > { %p23_p10 = scmp.ge.s32.totalorder %s26_s26, 4   ;;  %s1528_s22 = smov %s1200_s23 }
 0x2d1   : > { %s1529_s23 = smov %s1358_s14  ;;  %s1530_s24 = smov %s1208_s25 }
 0x2d2   : > { %s1531_s25 = smov %s1533_s28  ;;  %25 = sbr.rel (!%p23_p10) target bundleno = 14 (0xe), region = 122 }
 0x2d7   :  { %690 = vsyncpa [#allocation4], 1 }
 0x2d8   :  { %692 = vsyncpa [#allocation4 + $0x1], 1 }
 0x2d9   :  { %693 = vsyncpa [#allocation7], 1 }
 0x2da   :  { %695 = vsyncpa [#allocation7 + $0x1], 1 }
 0x2db   :  { %696 = vsyncpa [#allocation10], 1 }
 0x2dc   :  { %697 = vsyncpa [#allocation5], 1 }
 0x2dd   :  { %699 = vsyncpa [#allocation5 + $0x1], 1 }

</bundles_post_ra>
